<compile_context>
chip_gen: v7x
topology: tpu7x:2x2x1
jax: 0.10.0
libtpu: 0.0.40
codegen_flags: <defaults>
</compile_context>

<pallas_src>
import jax
import jax.numpy as jnp
from jax.experimental import pallas as pl
from jax.experimental.pallas import tpu as pltpu


def _round_up(n, m):
    return ((n + m - 1) // m) * m


def _vmem_capacity_bytes():
    """Physical VMEM of the attached TPU generation; conservative fallback."""
    try:
        return int(pltpu.get_tpu_info().vmem_capacity_bytes)
    except Exception:
        return 64 * 1024 * 1024  # v7x-sized, safe everywhere


def _gru_kernel(x_ref, h_ref, wx_ref, whzr_ref, wqh_ref, b_ref, o_ref):
    """Fused GRU cell for one batch tile."""
    ch = o_ref.shape[-1]        # true hidden width
    chp = wqh_ref.shape[-1]     # lane-padded per-gate width (multiple of 128)

    x = x_ref[...]
    h = h_ref[...]
    h_f32 = h.astype(jnp.float32)

    # Fused x-projection for all three gates + one lane-dense bias add.
    gx = jnp.dot(x, wx_ref[...], preferred_element_type=jnp.float32) + b_ref[...]
    # Fused h-projection for the z and r gates.
    gh_zr = jnp.dot(h, whzr_ref[...], preferred_element_type=jnp.float32)

    # Both sigmoids in one wide EUP push; gate boundaries are lane-aligned.
    zr = jax.nn.sigmoid(gx[:, : 2 * chp] + gh_zr)
    z = zr[:, :ch]                   # sub-slice stays inside the first lane tile
    r = zr[:, chp:chp + ch]

    # Candidate: q = tanh(x @ Wq_x + (r*h) @ Wq_h + b_q).
    # Narrow r*h only for the MXU operand (weight dtype); accumulate in f32.
    rh = (r * h_f32).astype(wqh_ref.dtype)
    q_full = jnp.tanh(
        gx[:, 2 * chp:]
        + jnp.dot(rh, wqh_ref[...], preferred_element_type=jnp.float32)
    )
    q = q_full[:, :ch]

    # h' = (1 - z) * h + z * q  ==  h + z * (q - h)   (one fewer vmul).
    o_ref[...] = (h_f32 + z * (q - h_f32)).astype(o_ref.dtype)


def prepare_fused_params(params, x_channels, h_channels, compute_dtype=None,
                         lane=128):
    """Fuse + transpose PyTorch-layout GRU weights once (hoisted out of the step).

    Each gate's output dimension is zero-padded to Chp = round_up(Ch, lane) so
    all matmul-N dims and gate-slice boundaries inside the kernel are lane-aligned.
    """
    cx, ch = x_channels, h_channels
    chp = _round_up(ch, lane)

    def split_t(w):
        wt = jnp.transpose(w)            # (Cx+Ch, Ch)
        return wt[:cx, :], wt[cx:, :]    # (Cx, Ch), (Ch, Ch)

    def pad_n(w):                        # zero-pad the output (N) dim Ch -> Chp
        return jnp.pad(w, ((0, 0), (0, chp - ch))) if chp != ch else w

    wzx, wzh = split_t(params["w_z"])
    wrx, wrh = split_t(params["w_r"])
    wqx, wqh = split_t(params["w_q"])

    w_x = jnp.concatenate([pad_n(wzx), pad_n(wrx), pad_n(wqx)], axis=1)  # (Cx, 3*Chp)
    w_h_zr = jnp.concatenate([pad_n(wzh), pad_n(wrh)], axis=1)           # (Ch, 2*Chp)
    w_qh = pad_n(wqh)                                                    # (Ch, Chp)

    def pad_b(bvec):
        b2 = bvec.reshape(1, ch)
        return jnp.pad(b2, ((0, 0), (0, chp - ch))) if chp != ch else b2

    b = jnp.concatenate(
        [pad_b(params["b_z"]), pad_b(params["b_r"]), pad_b(params["b_q"])],
        axis=1,
    ).astype(jnp.float32)                                                # (1, 3*Chp)

    if compute_dtype is not None:
        w_x = w_x.astype(compute_dtype)
        w_h_zr = w_h_zr.astype(compute_dtype)
        w_qh = w_qh.astype(compute_dtype)

    return w_x, w_h_zr, w_qh, b


def gru_pallas(x, h, fused_params, *, block_b=1024, donate_h=False):
    """x: (B, Cx), h: (B, Ch); fused_params from prepare_fused_params."""
    w_x, w_h_zr, w_qh, b = fused_params
    B, cx = x.shape
    bh, ch = h.shape
    chp = w_qh.shape[-1]
    assert B == bh
    assert w_x.shape == (cx, 3 * chp)
    assert w_h_zr.shape == (ch, 2 * chp)
    assert w_qh.shape == (ch, chp)
    assert b.shape == (1, 3 * chp)

    elem = jnp.dtype(x.dtype).itemsize
    wbytes = jnp.dtype(w_x.dtype).itemsize
    row_align = 8 if elem >= 4 else (32 // elem)   # sublane packing (16 for bf16)

    # --- Generation-aware VMEM budget -> batch tile size -------------------
    vmem_cap = _vmem_capacity_bytes()
    weight_bytes = (w_x.size + w_h_zr.size + w_qh.size) * wbytes + b.size * 4
    # Budget for 2x weights in case single-buffering is not honored.
    budget = int(vmem_cap * 0.8) - 2 * weight_bytes
    # Streamed bytes per batch row (x + h in, out; double-buffered) plus f32
    # intermediates (gx / gh_zr / zr / q ~ 10*Chp words live per row).
    per_row = 2 * (cx + 2 * ch) * elem + 10 * chp * 4
    tb_cap = max(row_align, budget // max(per_row, 1))

    tb = min(block_b, tb_cap, _round_up(B, row_align))
    tb = max(row_align, (tb // row_align) * row_align)

    # --- Megacore-friendly tile count (v7x has 2 TensorCores) --------------
    def _ntiles(t):
        return pl.cdiv(B, t)

    if _ntiles(tb) == 1 and B >= 2 * row_align:
        tb = _round_up(pl.cdiv(B, 2), row_align)
    elif _ntiles(tb) > 1 and _ntiles(tb) % 2 == 1:
        cand = _round_up(pl.cdiv(B, _ntiles(tb) + 1), row_align)
        if cand >= row_align and _ntiles(cand) % 2 == 0:
            tb = cand

    grid = (_ntiles(tb),)   # ragged last tile handled by Pallas (no HBM padding)

    vmem_limit = max(32 * 1024 * 1024, min(int(vmem_cap * 0.9), 127 * 1024 * 1024))

    streamed = lambda cols: pl.BlockSpec((tb, cols), lambda i: (i, 0))

    def _call(single_buffer_weights):
        if single_buffer_weights:
            # Block index never changes -> a single VMEM buffer is enough;
            # halves the resident-weight footprint (matters on v7x's 64 MiB).
            resident = lambda shape: pl.BlockSpec(
                shape, lambda i: (0, 0), pipeline_mode=pl.Buffered(1))
        else:
            resident = lambda shape: pl.BlockSpec(shape, lambda i: (0, 0))

        return pl.pallas_call(
            _gru_kernel,
            out_shape=jax.ShapeDtypeStruct((B, ch), h.dtype),
            grid=grid,
            in_specs=[
                streamed(cx),                  # x   (streamed, double-buffered)
                streamed(ch),                  # h   (streamed, double-buffered)
                resident((cx, 3 * chp)),       # fused x-weight (VMEM-resident)
                resident((ch, 2 * chp)),       # fused z/r h-weight
                resident((ch, chp)),           # q h-weight
                resident((1, 3 * chp)),        # fused bias (f32)
            ],
            out_specs=streamed(ch),
            # Recurrent rollouts: alias h -> h' for true in-place hidden-state
            # update (no internal padded copy anymore, so this now really works).
            input_output_aliases=({1: 0} if donate_h else {}),
            compiler_params=pltpu.CompilerParams(
                dimension_semantics=("parallel",),   # batch tiles independent
                vmem_limit_bytes=vmem_limit,
            ),
        )(x, h, w_x, w_h_zr, w_qh, b)

    try:
        return _call(True)
    except Exception:
        # Fallback if Buffered(1) is rejected by this jax/Mosaic version.
        return _call(False)


def gru_reference(x, h, params):
    """Pure-JAX reference matching the PyTorch forward exactly."""
    xh = jnp.concatenate([x, h], axis=1)
    z = jax.nn.sigmoid(xh @ params["w_z"].T + params["b_z"])
    r = jax.nn.sigmoid(xh @ params["w_r"].T + params["b_r"])
    xh2 = jnp.concatenate([x, r * h], axis=1)
    q = jnp.tanh(xh2 @ params["w_q"].T + params["b_q"])
    return (1.0 - z) * h + z * q


def init_params(key, x_channels, h_channels):
    """Deterministic init mimicking torch.nn.Linear default (uniform +/- 1/sqrt(fan_in))."""
    fan_in = x_channels + h_channels
    bound = 1.0 / jnp.sqrt(fan_in)
    ks = jax.random.split(key, 6)
    u = lambda k, shape: jax.random.uniform(k, shape, jnp.float32, -bound, bound)
    return {
        "w_z": u(ks[0], (h_channels, fan_in)), "b_z": u(ks[1], (h_channels,)),
        "w_r": u(ks[2], (h_channels, fan_in)), "b_r": u(ks[3], (h_channels,)),
        "w_q": u(ks[4], (h_channels, fan_in)), "b_q": u(ks[5], (h_channels,)),
    }


if __name__ == "__main__":
    key = jax.random.PRNGKey(0)
    k_x, k_h, k_p = jax.random.split(key, 3)

    B = 8
    x_channels = 32
    h_channels = 32

    x = jax.random.normal(k_x, (B, x_channels), jnp.float32)
    h = jax.random.normal(k_h, (B, h_channels), jnp.float32)
    params = init_params(k_p, x_channels, h_channels)

    # ---- float32 path (tight tolerance vs PyTorch-equivalent reference) ----
    fused_f32 = prepare_fused_params(params, x_channels, h_channels)
    out = jax.block_until_ready(gru_pallas(x, h, fused_f32))
    ref = gru_reference(x, h, params)
    assert out.shape == (B, h_channels)
    assert jnp.allclose(out, ref, atol=1e-5, rtol=1e-5), "f32 mismatch vs reference"

    # ---- ragged batch (B not a multiple of the tile): no HBM pad/slice -----
    B2 = 13
    x2 = jax.random.normal(jax.random.PRNGKey(7), (B2, x_channels), jnp.float32)
    h2 = jax.random.normal(jax.random.PRNGKey(9), (B2, h_channels), jnp.float32)
    out2 = jax.block_until_ready(gru_pallas(x2, h2, fused_f32))
    ref2 = gru_reference(x2, h2, params)
    assert out2.shape == (B2, h_channels)
    assert jnp.allclose(out2, ref2, atol=1e-5, rtol=1e-5), "ragged-B mismatch"

    # ---- bf16 operand path (MXU bf16, f32 accumulate/elementwise inside) ----
    x_bf = x.astype(jnp.bfloat16)
    h_bf = h.astype(jnp.bfloat16)
    fused_bf = prepare_fused_params(params, x_channels, h_channels,
                                    compute_dtype=jnp.bfloat16)
    out_bf = jax.block_until_ready(gru_pallas(x_bf, h_bf, fused_bf))
    params_bf = {
        k: (v.astype(jnp.bfloat16).astype(jnp.float32) if k.startswith("w") else v)
        for k, v in params.items()
    }
    ref_bf = gru_reference(x_bf.astype(jnp.float32), h_bf.astype(jnp.float32),
                           params_bf)
    assert out_bf.dtype == jnp.bfloat16
    assert jnp.allclose(out_bf.astype(jnp.float32), ref_bf, atol=3e-2, rtol=3e-2), \
        "bf16 mismatch vs reference"

    print("KERNEL_OK")
</pallas_src>

<mosaic_0001>
module attributes {stable_mosaic.version = 11 : i64} {
  func.func @_gru_kernel(%arg0: i32, %arg1: memref<8x32xf32, #tpu.memory_space<vmem>>, %arg2: memref<8x32xf32, #tpu.memory_space<vmem>>, %arg3: memref<32x384xf32, #tpu.memory_space<vmem>>, %arg4: memref<32x256xf32, #tpu.memory_space<vmem>>, %arg5: memref<32x128xf32, #tpu.memory_space<vmem>>, %arg6: memref<1x384xf32, #tpu.memory_space<vmem>>, %arg7: memref<8x32xf32, #tpu.memory_space<vmem>>) attributes {dimension_semantics = [#tpu.dimension_semantics<parallel>], iteration_bounds = array<i64: 1>, scalar_prefetch = 0 : i64, scratch_operands = 0 : i64, tpu.core_type = #tpu.core_type<tc>, window_params = [{transform_indices = @transform_0, window_bounds = array<i64: 8, 32>}, {transform_indices = @transform_1, window_bounds = array<i64: 8, 32>}, {pipeline_mode = #tpu.pipeline_mode<synchronous>, transform_indices = @transform_2, window_bounds = array<i64: 32, 384>}, {pipeline_mode = #tpu.pipeline_mode<synchronous>, transform_indices = @transform_3, window_bounds = array<i64: 32, 256>}, {pipeline_mode = #tpu.pipeline_mode<synchronous>, transform_indices = @transform_4, window_bounds = array<i64: 32, 128>}, {pipeline_mode = #tpu.pipeline_mode<synchronous>, transform_indices = @transform_5, window_bounds = array<i64: 1, 384>}, {transform_indices = @transform_6, window_bounds = array<i64: 8, 32>}]} {
    %c0 = arith.constant 0 : index
    %c0_0 = arith.constant 0 : index
    %0 = vector.load %arg1[%c0, %c0_0] : memref<8x32xf32, #tpu.memory_space<vmem>>, vector<8x32xf32>
    %c0_1 = arith.constant 0 : index
    %c0_2 = arith.constant 0 : index
    %1 = vector.load %arg2[%c0_1, %c0_2] : memref<8x32xf32, #tpu.memory_space<vmem>>, vector<8x32xf32>
    %c0_3 = arith.constant 0 : index
    %c0_4 = arith.constant 0 : index
    %2 = vector.load %arg3[%c0_3, %c0_4] : memref<32x384xf32, #tpu.memory_space<vmem>>, vector<32x384xf32>
    %cst = arith.constant dense<0.000000e+00> : vector<8x384xf32>
    %3 = tpu.matmul %0, %2, %cst {dimension_numbers = #tpu.dot_dimension_numbers<[1], [0], [0], [1], [0, 0, 1, 1], [], []>} : vector<8x32xf32>, vector<32x384xf32>, vector<8x384xf32> -> vector<8x384xf32>
    %c0_5 = arith.constant 0 : index
    %c0_6 = arith.constant 0 : index
    %4 = vector.load %arg6[%c0_5, %c0_6] : memref<1x384xf32, #tpu.memory_space<vmem>>, vector<1x384xf32>
    %5 = vector.broadcast %4 : vector<1x384xf32> to vector<8x384xf32>
    %6 = arith.addf %3, %5 : vector<8x384xf32>
    %c0_7 = arith.constant 0 : index
    %c0_8 = arith.constant 0 : index
    %7 = vector.load %arg4[%c0_7, %c0_8] : memref<32x256xf32, #tpu.memory_space<vmem>>, vector<32x256xf32>
    %cst_9 = arith.constant dense<0.000000e+00> : vector<8x256xf32>
    %8 = tpu.matmul %1, %7, %cst_9 {dimension_numbers = #tpu.dot_dimension_numbers<[1], [0], [0], [1], [0, 0, 1, 1], [], []>} : vector<8x32xf32>, vector<32x256xf32>, vector<8x256xf32> -> vector<8x256xf32>
    %9 = vector.extract_strided_slice %6 {offsets = [0, 0], sizes = [8, 256], strides = [1, 1]} : vector<8x384xf32> to vector<8x256xf32>
    %10 = arith.addf %9, %8 : vector<8x256xf32>
    %11 = arith.negf %10 : vector<8x256xf32>
    %12 = math.exp %11 : vector<8x256xf32>
    %cst_10 = arith.constant 1.000000e+00 : f32
    %13 = vector.broadcast %cst_10 : f32 to vector<8x256xf32>
    %14 = arith.addf %13, %12 : vector<8x256xf32>
    %15 = arith.divf %13, %14 : vector<8x256xf32>
    %16 = vector.extract_strided_slice %15 {offsets = [0, 0], sizes = [8, 32], strides = [1, 1]} : vector<8x256xf32> to vector<8x32xf32>
    %17 = vector.extract_strided_slice %15 {offsets = [0, 128], sizes = [8, 32], strides = [1, 1]} : vector<8x256xf32> to vector<8x32xf32>
    %18 = arith.mulf %17, %1 : vector<8x32xf32>
    %19 = vector.extract_strided_slice %6 {offsets = [0, 256], sizes = [8, 128], strides = [1, 1]} : vector<8x384xf32> to vector<8x128xf32>
    %c0_11 = arith.constant 0 : index
    %c0_12 = arith.constant 0 : index
    %20 = vector.load %arg5[%c0_11, %c0_12] : memref<32x128xf32, #tpu.memory_space<vmem>>, vector<32x128xf32>
    %cst_13 = arith.constant dense<0.000000e+00> : vector<8x128xf32>
    %21 = tpu.matmul %18, %20, %cst_13 {dimension_numbers = #tpu.dot_dimension_numbers<[1], [0], [0], [1], [0, 0, 1, 1], [], []>} : vector<8x32xf32>, vector<32x128xf32>, vector<8x128xf32> -> vector<8x128xf32>
    %22 = arith.addf %19, %21 : vector<8x128xf32>
    %23 = math.tanh %22 : vector<8x128xf32>
    %24 = vector.extract_strided_slice %23 {offsets = [0, 0], sizes = [8, 32], strides = [1, 1]} : vector<8x128xf32> to vector<8x32xf32>
    %25 = arith.subf %24, %1 : vector<8x32xf32>
    %26 = arith.mulf %16, %25 : vector<8x32xf32>
    %27 = arith.addf %1, %26 : vector<8x32xf32>
    %c0_14 = arith.constant 0 : index
    %c0_15 = arith.constant 0 : index
    %28 = vector.load %arg7[%c0_14, %c0_15] : memref<8x32xf32, #tpu.memory_space<vmem>>, vector<8x32xf32>
    tpu.vector_store %arg7[%c0_14, %c0_15], %27 {strides = array<i32>} : memref<8x32xf32, #tpu.memory_space<vmem>>, vector<8x32xf32>,
    return
  }
  func.func @transform_0(%arg0: i32) -> (i32, i32) {
    %c0_i32 = arith.constant 0 : i32
    %c0_i32_0 = arith.constant 0 : i32
    return %arg0, %c0_i32 : i32, i32
  }
  func.func @transform_1(%arg0: i32) -> (i32, i32) {
    %c0_i32 = arith.constant 0 : i32
    %c0_i32_0 = arith.constant 0 : i32
    return %arg0, %c0_i32 : i32, i32
  }
  func.func @transform_2(%arg0: i32) -> (i32, i32) {
    %c0_i32 = arith.constant 0 : i32
    %c0_i32_0 = arith.constant 0 : i32
    %c0_i32_1 = arith.constant 0 : i32
    return %c0_i32, %c0_i32_0 : i32, i32
  }
  func.func @transform_3(%arg0: i32) -> (i32, i32) {
    %c0_i32 = arith.constant 0 : i32
    %c0_i32_0 = arith.constant 0 : i32
    %c0_i32_1 = arith.constant 0 : i32
    return %c0_i32, %c0_i32_0 : i32, i32
  }
  func.func @transform_4(%arg0: i32) -> (i32, i32) {
    %c0_i32 = arith.constant 0 : i32
    %c0_i32_0 = arith.constant 0 : i32
    %c0_i32_1 = arith.constant 0 : i32
    return %c0_i32, %c0_i32_0 : i32, i32
  }
  func.func @transform_5(%arg0: i32) -> (i32, i32) {
    %c0_i32 = arith.constant 0 : i32
    %c0_i32_0 = arith.constant 0 : i32
    %c0_i32_1 = arith.constant 0 : i32
    return %c0_i32, %c0_i32_0 : i32, i32
  }
  func.func @transform_6(%arg0: i32) -> (i32, i32) {
    %c0_i32 = arith.constant 0 : i32
    %c0_i32_0 = arith.constant 0 : i32
    return %arg0, %c0_i32 : i32, i32
  }
}

module attributes {stable_mosaic.version = 11 : i64} {
  func.func @_gru_kernel(%arg0: i32, %arg1: memref<8x32xf32, #tpu.memory_space<vmem>>, %arg2: memref<8x32xf32, #tpu.memory_space<vmem>>, %arg3: memref<32x384xf32, #tpu.memory_space<vmem>>, %arg4: memref<32x256xf32, #tpu.memory_space<vmem>>, %arg5: memref<32x128xf32, #tpu.memory_space<vmem>>, %arg6: memref<1x384xf32, #tpu.memory_space<vmem>>, %arg7: memref<8x32xf32, #tpu.memory_space<vmem>>) attributes {dimension_semantics = [#tpu.dimension_semantics<parallel>], iteration_bounds = array<i64: 1>, scalar_prefetch = 0 : i64, scratch_operands = 0 : i64, tpu.core_type = #tpu.core_type<tc>, window_params = [{transform_indices = @transform_0, window_bounds = array<i64: 8, 32>}, {transform_indices = @transform_1, window_bounds = array<i64: 8, 32>}, {pipeline_mode = #tpu.pipeline_mode<synchronous>, transform_indices = @transform_2, window_bounds = array<i64: 32, 384>}, {pipeline_mode = #tpu.pipeline_mode<synchronous>, transform_indices = @transform_3, window_bounds = array<i64: 32, 256>}, {pipeline_mode = #tpu.pipeline_mode<synchronous>, transform_indices = @transform_4, window_bounds = array<i64: 32, 128>}, {pipeline_mode = #tpu.pipeline_mode<synchronous>, transform_indices = @transform_5, window_bounds = array<i64: 1, 384>}, {transform_indices = @transform_6, window_bounds = array<i64: 8, 32>}]} {
    %c0 = arith.constant 0 : index
    %c0_0 = arith.constant 0 : index
    %0 = vector.load %arg1[%c0, %c0_0] : memref<8x32xf32, #tpu.memory_space<vmem>>, vector<8x32xf32>
    %c0_1 = arith.constant 0 : index
    %c0_2 = arith.constant 0 : index
    %1 = vector.load %arg2[%c0_1, %c0_2] : memref<8x32xf32, #tpu.memory_space<vmem>>, vector<8x32xf32>
    %c0_3 = arith.constant 0 : index
    %c0_4 = arith.constant 0 : index
    %2 = vector.load %arg3[%c0_3, %c0_4] : memref<32x384xf32, #tpu.memory_space<vmem>>, vector<32x384xf32>
    %cst = arith.constant dense<0.000000e+00> : vector<8x384xf32>
    %3 = tpu.matmul %0, %2, %cst {dimension_numbers = #tpu.dot_dimension_numbers<[1], [0], [0], [1], [0, 0, 1, 1], [], []>} : vector<8x32xf32>, vector<32x384xf32>, vector<8x384xf32> -> vector<8x384xf32>
    %c0_5 = arith.constant 0 : index
    %c0_6 = arith.constant 0 : index
    %4 = vector.load %arg6[%c0_5, %c0_6] : memref<1x384xf32, #tpu.memory_space<vmem>>, vector<1x384xf32>
    %5 = vector.broadcast %4 : vector<1x384xf32> to vector<8x384xf32>
    %6 = arith.addf %3, %5 : vector<8x384xf32>
    %c0_7 = arith.constant 0 : index
    %c0_8 = arith.constant 0 : index
    %7 = vector.load %arg4[%c0_7, %c0_8] : memref<32x256xf32, #tpu.memory_space<vmem>>, vector<32x256xf32>
    %cst_9 = arith.constant dense<0.000000e+00> : vector<8x256xf32>
    %8 = tpu.matmul %1, %7, %cst_9 {dimension_numbers = #tpu.dot_dimension_numbers<[1], [0], [0], [1], [0, 0, 1, 1], [], []>} : vector<8x32xf32>, vector<32x256xf32>, vector<8x256xf32> -> vector<8x256xf32>
    %9 = vector.extract_strided_slice %6 {offsets = [0, 0], sizes = [8, 256], strides = [1, 1]} : vector<8x384xf32> to vector<8x256xf32>
    %10 = arith.addf %9, %8 : vector<8x256xf32>
    %11 = arith.negf %10 : vector<8x256xf32>
    %12 = math.exp %11 : vector<8x256xf32>
    %cst_10 = arith.constant 1.000000e+00 : f32
    %13 = vector.broadcast %cst_10 : f32 to vector<8x256xf32>
    %14 = arith.addf %13, %12 : vector<8x256xf32>
    %15 = arith.divf %13, %14 : vector<8x256xf32>
    %16 = vector.extract_strided_slice %15 {offsets = [0, 0], sizes = [8, 32], strides = [1, 1]} : vector<8x256xf32> to vector<8x32xf32>
    %17 = vector.extract_strided_slice %15 {offsets = [0, 128], sizes = [8, 32], strides = [1, 1]} : vector<8x256xf32> to vector<8x32xf32>
    %18 = arith.mulf %17, %1 : vector<8x32xf32>
    %19 = vector.extract_strided_slice %6 {offsets = [0, 256], sizes = [8, 128], strides = [1, 1]} : vector<8x384xf32> to vector<8x128xf32>
    %c0_11 = arith.constant 0 : index
    %c0_12 = arith.constant 0 : index
    %20 = vector.load %arg5[%c0_11, %c0_12] : memref<32x128xf32, #tpu.memory_space<vmem>>, vector<32x128xf32>
    %cst_13 = arith.constant dense<0.000000e+00> : vector<8x128xf32>
    %21 = tpu.matmul %18, %20, %cst_13 {dimension_numbers = #tpu.dot_dimension_numbers<[1], [0], [0], [1], [0, 0, 1, 1], [], []>} : vector<8x32xf32>, vector<32x128xf32>, vector<8x128xf32> -> vector<8x128xf32>
    %22 = arith.addf %19, %21 : vector<8x128xf32>
    %23 = math.tanh %22 : vector<8x128xf32>
    %24 = vector.extract_strided_slice %23 {offsets = [0, 0], sizes = [8, 32], strides = [1, 1]} : vector<8x128xf32> to vector<8x32xf32>
    %25 = arith.subf %24, %1 : vector<8x32xf32>
    %26 = arith.mulf %16, %25 : vector<8x32xf32>
    %27 = arith.addf %1, %26 : vector<8x32xf32>
    %c0_14 = arith.constant 0 : index
    %c0_15 = arith.constant 0 : index
    %28 = vector.load %arg7[%c0_14, %c0_15] : memref<8x32xf32, #tpu.memory_space<vmem>>, vector<8x32xf32>
    tpu.vector_store %arg7[%c0_14, %c0_15], %27 {strides = array<i32>} : memref<8x32xf32, #tpu.memory_space<vmem>>, vector<8x32xf32>,
    return
  }
  func.func @transform_0(%arg0: i32) -> (i32, i32) {
    %c0_i32 = arith.constant 0 : i32
    %c0_i32_0 = arith.constant 0 : i32
    return %arg0, %c0_i32 : i32, i32
  }
  func.func @transform_1(%arg0: i32) -> (i32, i32) {
    %c0_i32 = arith.constant 0 : i32
    %c0_i32_0 = arith.constant 0 : i32
    return %arg0, %c0_i32 : i32, i32
  }
  func.func @transform_2(%arg0: i32) -> (i32, i32) {
    %c0_i32 = arith.constant 0 : i32
    %c0_i32_0 = arith.constant 0 : i32
    %c0_i32_1 = arith.constant 0 : i32
    return %c0_i32, %c0_i32_0 : i32, i32
  }
  func.func @transform_3(%arg0: i32) -> (i32, i32) {
    %c0_i32 = arith.constant 0 : i32
    %c0_i32_0 = arith.constant 0 : i32
    %c0_i32_1 = arith.constant 0 : i32
    return %c0_i32, %c0_i32_0 : i32, i32
  }
  func.func @transform_4(%arg0: i32) -> (i32, i32) {
    %c0_i32 = arith.constant 0 : i32
    %c0_i32_0 = arith.constant 0 : i32
    %c0_i32_1 = arith.constant 0 : i32
    return %c0_i32, %c0_i32_0 : i32, i32
  }
  func.func @transform_5(%arg0: i32) -> (i32, i32) {
    %c0_i32 = arith.constant 0 : i32
    %c0_i32_0 = arith.constant 0 : i32
    %c0_i32_1 = arith.constant 0 : i32
    return %c0_i32, %c0_i32_0 : i32, i32
  }
  func.func @transform_6(%arg0: i32) -> (i32, i32) {
    %c0_i32 = arith.constant 0 : i32
    %c0_i32_0 = arith.constant 0 : i32
    return %arg0, %c0_i32 : i32, i32
  }
}

</mosaic_0001>

<bundles_post_ra>
// kernel: tpu_custom_call.1
= control target key start
LH: loop header
LB: loop body
LE: loop exit
PB: predicated region body
PF: predicated region fallthrough
CT: control target
= control target key end

     0   :  { %11 = vsyncpa [#allocation3], 0  ;;  %s849_s0 = inlined_call_operand.hbm [shape: f32[8,32], index: 0, kind: input, shape index: {}]   ;;  %s850_s1 = inlined_call_operand.hbm [shape: f32[8,32], index: 1, kind: input, shape index: {}]   ;;  %s851_s2 = inlined_call_operand.hbm [shape: f32[32,384], index: 2, kind: input, shape index: {}]   ;;  %s852_s3 = inlined_call_operand.hbm [shape: f32[32,256], index: 3, kind: input, shape index: {}]   ;;  %s853_s4 = inlined_call_operand.hbm [shape: f32[32,128], index: 4, kind: input, shape index: {}]   ;;  %s854_s5 = inlined_call_operand.vmem [shape: f32[1,384], index: 5, kind: input, shape index: {}]   ;;  %s855_s6 = inlined_call_operand.hbm [shape: f32[8,32], index: 6, kind: output, shape index: {}]  }
   0x1   :  { %12 = vsyncpa [#allocation6], 0 }
   0x2   :  { %13 = vsyncpa [#allocation9], 0 }
   0x3   :  { %14 = vsyncpa [#allocation4], 0  ;;  %s699_s21 = smov [#allocation5]   ;;  %s700_s23 = smov [#allocation8]  }
   0x4   :  { %s31_s22 = sshll.u32 %s699_s21, 4  ;;  %s52_s24 = sshll.u32 %s700_s23, 4  ;;  %s32_s22 = int_to_ptr.vmem [resolvable:$true] %s31_s22  ;;  %s749_s24 = int_to_ptr.vmem [resolvable:$true] %s52_s24 }
   0x5   :  { %s559_s27 = scalar_lea.hbm %s850_s1, 128 }
   0x6   :  { %p560_p0 = scmp.ne.s32.totalorder %s850_s1, %s559_s27  ;;  %p563_p1 = scmp.lt.u32.totalorder %s559_s27, %s850_s1 }
   0x8   :  { %p565_p2 = pnand %p563_p1, %p560_p0 }
   0xa   :  { %568 = shalt.err (!%p565_p2)
}
   0xb   :  { %s569_s8 = scalar_lea.vmem %s32_s22, 128  ;;  %p574_p4 = scmp.lt.s32.totalorder %s32_s22, %s32_s22 }
   0xc   :  { %p570_p3 = scmp.ne.s32.totalorder %s32_s22, %s569_s8  ;;  %p575_p5 = scmp.lt.s32.totalorder %s569_s8, %s569_s8 }
   0xe   :  { %p576_p6 = por %p575_p5, %p574_p4 }
  0x10   :  { %p577_p7 = pnand %p576_p6, %p570_p3 }
  0x12   :  { %580 = shalt.err (!%p577_p7)
}
  0x13   :  { %34 = dma.hbm_to_vmem [thread:$0]  %s850_s1, 128, %s32_s22, [#allocation6]  }
  0x14   :  { %s581_s13 = scalar_lea.hbm %s852_s3, 1024 }
  0x15   :  { %p582_p8 = scmp.ne.s32.totalorder %s852_s3, %s581_s13  ;;  %p585_p9 = scmp.lt.u32.totalorder %s581_s13, %s852_s3 }
  0x17   :  { %p587_p10 = pnand %p585_p9, %p582_p8 }
  0x19   :  { %590 = shalt.err (!%p587_p10)
}
  0x1a   :  { %s591_s18 = scalar_lea.vmem %s749_s24, 1024  ;;  %p596_p12 = scmp.lt.s32.totalorder %s749_s24, %s749_s24 }
  0x1b   :  { %p592_p11 = scmp.ne.s32.totalorder %s749_s24, %s591_s18  ;;  %p597_p13 = scmp.lt.s32.totalorder %s591_s18, %s591_s18 }
  0x1d   :  { %p598_p0 = por %p597_p13, %p596_p12 }
  0x1f   :  { %p599_p1 = pnand %p598_p0, %p592_p11 }
  0x21   :  { %602 = shalt.err (!%p599_p1)
}
  0x22   :  { %s701_s1 = smov 256   ;;  %s702_s19 = smov 16  }
  0x23   :  { %58 = dma.hbm_to_vmem [thread:$0]  %s852_s3, 1024, %s749_s24, [#allocation9], %s701_s1, %s701_s1, %s702_s19  }
  0x24   :  { %s703_s22 = smov [#allocation2]   ;;  %s704_s25 = smov [#allocation7]  }
  0x25   :  { %s21_s23 = sshll.u32 %s703_s22, 4  ;;  %s40_s26 = sshll.u32 %s704_s25, 4  ;;  %s22_s23 = int_to_ptr.vmem [resolvable:$true] %s21_s23  ;;  %s780_s26 = int_to_ptr.vmem [resolvable:$true] %s40_s26 }
  0x26   :  { %s603_s29 = scalar_lea.hbm %s849_s0, 128 }
  0x27   :  { %p604_p2 = scmp.ne.s32.totalorder %s849_s0, %s603_s29  ;;  %p607_p3 = scmp.lt.u32.totalorder %s603_s29, %s849_s0 }
  0x29   :  { %p609_p4 = pnand %p607_p3, %p604_p2 }
  0x2b   :  { %612 = shalt.err (!%p609_p4)
}
  0x2c   :  { %s613_s3 = scalar_lea.vmem %s22_s23, 128  ;;  %p618_p6 = scmp.lt.s32.totalorder %s22_s23, %s22_s23 }
  0x2d   :  { %p614_p5 = scmp.ne.s32.totalorder %s22_s23, %s613_s3  ;;  %p619_p7 = scmp.lt.s32.totalorder %s613_s3, %s613_s3 }
  0x2f   :  { %p620_p8 = por %p619_p7, %p618_p6 }
  0x31   :  { %p621_p9 = pnand %p620_p8, %p614_p5 }
  0x33   :  { %624 = shalt.err (!%p621_p9)
}
  0x34   :  { %24 = dma.hbm_to_vmem [thread:$0]  %s849_s0, 128, %s22_s23, [#allocation3]  }
  0x35   :  { %s625_s13 = scalar_lea.hbm %s851_s2, 1536 }
  0x36   :  { %p626_p10 = scmp.ne.s32.totalorder %s851_s2, %s625_s13  ;;  %p629_p11 = scmp.lt.u32.totalorder %s625_s13, %s851_s2 }
  0x38   :  { %p631_p12 = pnand %p629_p11, %p626_p10 }
  0x3a   :  { %634 = shalt.err (!%p631_p12)
}
  0x3b   :  { %s635_s18 = scalar_lea.vmem %s780_s26, 1536  ;;  %p640_p0 = scmp.lt.s32.totalorder %s780_s26, %s780_s26 }
  0x3c   :  { %p636_p13 = scmp.ne.s32.totalorder %s780_s26, %s635_s18  ;;  %p641_p1 = scmp.lt.s32.totalorder %s635_s18, %s635_s18 }
  0x3e   :  { %p642_p2 = por %p641_p1, %p640_p0 }
  0x40   :  { %p643_p3 = pnand %p642_p2, %p636_p13 }
  0x42   :  { %646 = shalt.err (!%p643_p3)
}
  0x43   :  { %s705_s0 = smov 384   ;;  %s706_s1 = smov 24  }
  0x44   :  { %46 = dma.hbm_to_vmem [thread:$0]  %s851_s2, 1536, %s780_s26, [#allocation6], %s705_s0, %s705_s0, %s706_s1  }
  0x45   :  { %s707_s21 = smov [#allocation10]   ;;  %s647_s27 = scalar_lea.hbm %s853_s4, 512 }
  0x46   :  { %s64_s22 = sshll.u32 %s707_s21, 4  ;;  %p648_p4 = scmp.ne.s32.totalorder %s853_s4, %s647_s27  ;;  %s65_s22 = int_to_ptr.vmem [resolvable:$true] %s64_s22 }
  0x47   :  { %p651_p5 = scmp.lt.u32.totalorder %s647_s27, %s853_s4 }
  0x49   :  { %p653_p6 = pnand %p651_p5, %p648_p4 }
  0x4b   :  { %656 = shalt.err (!%p653_p6)
}
  0x4c   :  { %s657_s8 = scalar_lea.vmem %s65_s22, 512  ;;  %p662_p8 = scmp.lt.s32.totalorder %s65_s22, %s65_s22 }
  0x4d   :  { %p658_p7 = scmp.ne.s32.totalorder %s65_s22, %s657_s8  ;;  %p663_p9 = scmp.lt.s32.totalorder %s657_s8, %s657_s8 }
  0x4f   :  { %p664_p10 = por %p663_p9, %p662_p8 }
  0x51   :  { %p665_p11 = pnand %p664_p10, %p658_p7 }
  0x53   :  { %668 = shalt.err (!%p665_p11)
}
  0x54   :  { %s708_s2 = smov 128   ;;  %s709_s26 = smov 8  }
  0x55   :  { %70 = dma.hbm_to_vmem [thread:$0]  %s853_s4, 512, %s65_s22, [#allocation9], %s708_s2, %s708_s2, %s709_s26  }
  0x56   :  { %691 = dma.done.wait [#allocation3], 128  }
  0x57   :  { %692 = vsyncadd [#allocation3], 4294967168 }
  0x58   :  { %693 = dma.done.wait [#allocation6], 1664  }
  0x59   :  { %694 = vsyncadd [#allocation6], 4294965632 }
  0x5a   :  { %695 = dma.done.wait [#allocation9], 1536  }
  0x5b   :  { %696 = vsyncadd [#allocation9], 4294965760  ;;  %v710_v0 = vmov 0.0   ;;  %v91_v1 = vld [vmem:[#allocation7 + $0x8] sm:$0xff]  ;;  %v94_v2 = vld [vmem:[#allocation7 + $0x20] sm:$0xff]  ;;  %vm119_vm0 = vcmask 261120   ;;  %v104_v40 = vlaneseq }
  0x5c   :  { %187 = vmatprep.mubr.f32.mxu0 %v710_v0  ;;  %v90_v3 = vld [vmem:[#allocation7] sm:$0xff]  ;;  %v499_v4 = vpack.c.bf16 %v94_v2, %v91_v1  ;;  %v93_v5 = vld [vmem:[#allocation7 + $0x18] sm:$0xff]  ;;  %v100_v7 = vld [vmem:[#allocation7 + $0x50] sm:$0xff]  ;;  %v711_v30 = vmov 0.0|0.0   ;;  %vm712_vm1 = vmmov 0  }
  0x5d   :  { %v97_v6 = vld [vmem:[#allocation7 + $0x38] sm:$0xff]  ;;  %v501_v8 = vpack.c.bf16 %v93_v5, %v90_v3  ;;  %v96_v10 = vld [vmem:[#allocation7 + $0x30] sm:$0xff]  ;;  %v99_v11 = vld [vmem:[#allocation7 + $0x48] sm:$0xff]  ;;  %507 = vmatprep.subr.bf16.mxu1 %v711_v30  ;;  %485 = vmatprep.mubr.msk.f32.mxu1 %vm712_vm1, %v710_v0  ;;  %v105_v41 = vshrl.u32 %v104_v40, 7 }
  0x5e   :  { %v503_v9 = vpack.c.bf16 %v100_v7, %v97_v6  ;;  %500 = vmatprep.subr.bf16.mxu0 %v499_v4  ;;  %v265_v12 = vld [vmem:[#allocation8 + $0x8] sm:$0xff]  ;;  %v267_v13 = vld [vmem:[#allocation8 + $0x18] sm:$0xff]  ;;  %v505_v14 = vpack.c.bf16 %v99_v11, %v96_v10  ;;  %v264_v16 = vld [vmem:[#allocation8] sm:$0xff] }
  0x5f   :  { %502 = vmatpush1.bf16.msra.mxu0 %v501_v8  ;;  %v513_v15 = vpack.c.bf16 %v267_v13, %v265_v12  ;;  %v266_v17 = vld [vmem:[#allocation8 + $0x10] sm:$0xff]  ;;  %v269_v18 = vld [vmem:[#allocation8 + $0x28] sm:$0xff]  ;;  %v271_v19 = vld [vmem:[#allocation8 + $0x38] sm:$0xff]  ;;  %v110_v42 = vsub.s32 1, %v105_v41  ;;  %v106_v53 = vsub.s32 0, %v105_v41  ;;  %v114_v57 = vsub.s32 2, %v105_v41 }
  0x60   :  { %504 = vmatprep.subr.bf16.mxu0 %v503_v9  ;;  %v88_v20 = vld [vmem:[#allocation2] sm:$0xff]  ;;  %v515_v21 = vpack.c.bf16 %v266_v17, %v264_v16  ;;  %v517_v22 = vpack.c.bf16 %v271_v19, %v269_v18  ;;  %v268_v23 = vld [vmem:[#allocation8 + $0x20] sm:$0xff]  ;;  %v824_v26 = vld [vmem:[#allocation5] sm:$0xff] }
  0x61   :  { %v270_v24 = vld [vmem:[#allocation8 + $0x30] sm:$0xff]  ;;  %v95_v28 = vld [vmem:[#allocation7 + $0x28] sm:$0xff]  ;;  %v98_v31 = vld [vmem:[#allocation7 + $0x40] sm:$0xff] }
  0x62   :  { %v519_v25 = vpack.c.bf16 %v270_v24, %v268_v23  ;;  %v92_v27 = vld [vmem:[#allocation7 + $0x10] sm:$0xff]  ;;  %v101_v32 = vld [vmem:[#allocation7 + $0x58] sm:$0xff]  ;;  %v361_v34 = vld [vmem:[#allocation10] sm:$0xff] }
  0x63   :  { %506 = vmatpush1.bf16.msra.mxu0 %v505_v14  ;;  %v508_v29 = vpack.c.bf16 %v95_v28, %v92_v27  ;;  %v511_v33 = vpack.c.bf16 %v101_v32, %v98_v31  ;;  %v362_v35 = vld [vmem:[#allocation10 + $0x8] sm:$0xff]  ;;  %v363_v37 = vld [vmem:[#allocation10 + $0x10] sm:$0xff]  ;;  %v364_v38 = vld [vmem:[#allocation10 + $0x18] sm:$0xff] }
  0x64   :  { %514 = vmatprep.subr.bf16.mxu0 %v513_v15  ;;  %v522_v36 = vpack.c.bf16 %v362_v35, %v361_v34  ;;  %v525_v39 = vpack.c.bf16 %v364_v38, %v363_v37  ;;  %v102_v43 = vld [vmem:[%s854_s5] sm:$0x7]  ;;  %s713_s5 = smov [#allocation11]  }
  0x65   :  { %509 = vmatpush3.bf16.msra.mxu1 %v508_v29  ;;  %v111_v44 = vrot.slane %v102_v43, %v110_v42  ;;  %v107_v54 = vrot.slane %v102_v43, %v106_v53  ;;  %v115_v58 = vrot.slane %v102_v43, %v114_v57  ;;  %s450_s10 = sshll.u32 %s713_s5, 4  ;;  %s451_s10 = int_to_ptr.vmem [resolvable:$true] %s450_s10 }
  0x66   :  { %461 = vmatmul.mubr.msk.f32.vlgmr.msra.gmra.mrb[0].mxu0 %vm119_vm0, %v88_v20  ;;  %510 = vmatprep.subr.bf16.mxu1 %v711_v30  ;;  %s669_s11 = scalar_lea.vmem %s451_s10, 128  ;;  %p674_p13 = scmp.lt.s32.totalorder %s451_s10, %s451_s10 }
  0x67   :  { %516 = vmatpush1.bf16.msra.mxu0 %v515_v21  ;;  %339 = vmatprep.mubr.f32.mxu0 %v710_v0  ;;  %p670_p12 = scmp.ne.s32.totalorder %s451_s10, %s669_s11  ;;  %p675_p0 = scmp.lt.s32.totalorder %s669_s11, %s669_s11 }
  0x68   :  { %518 = vmatprep.subr.bf16.mxu0 %v517_v22 }
  0x69   :  { %512 = vmatpush3.bf16.msra.mxu1 %v511_v33  ;;  %p676_p1 = por %p675_p0, %p674_p13 }
  0x6a   :  { %521 = vmatprep.subr.bf16.mxu1 %v711_v30 }
  0x6b   :  { %520 = vmatpush1.bf16.msra.mxu0 %v519_v25  ;;  %p677_p2 = pnand %p676_p1, %p670_p12 }
  0x6c   :  { %486 = vmatmul.mubr.msk.f32.vlgmr.msra.gmra.mrb[0].mxu1 %vm119_vm0, %v88_v20 }
  0x6d   :  { %523 = vmatpush3.bf16.msra.mxu1 %v522_v36  ;;  %496 = vmatprep.mubr.msk.f32.mxu1 %vm712_vm1, %v710_v0 }
  0x6e   :  { %463 = vmatmul.mubr.msk.f32.vlgmr.msra.gmra.mrb[0].mxu0 %vm119_vm0, %v824_v26  ;;  %524 = vmatprep.subr.bf16.mxu1 %v711_v30 }
  0x71   :  { %526 = vmatpush3.bf16.msra.mxu1 %v525_v39 }
 0x141   :  { %v341_v45 = vpop.f32.mrb[0].mxu0 }
 0x142   :  { %v343_v46 = vpop.f32.mrb[1].mxu0  ;;  %v527_v55 = vadd.f32 %v341_v45, %v107_v54 }
 0x143   :  { %v528_v47 = vadd.f32 %v343_v46, %v111_v44 }
 0x144   :  { %v464_v56 = vmul.f32 -1.442695, %v527_v55 }
 0x145   :  { %v465_v48 = vmul.f32 -1.442695, %v528_v47 }
 0x147   :  { %549 = vpow2.f32 %v465_v48 }
 0x151   :  { %v550_v49 = vpop.eup %549 }
 0x152   :  { %v355_v50 = vadd.f32 1.0, %v550_v49 }
 0x154   :  { %551 = vrcp.f32 %v355_v50 }
 0x155   :  { %553 = vpow2.f32 %v464_v56 }
 0x15e   :  { %v552_v51 = vpop.eup %551 }
 0x15f   :  { %v360_v52 = vmul.f32 %v552_v51, %v824_v26  ;;  %v554_v59 = vpop.eup %553 }
 0x160   :  { %v354_v61 = vadd.f32 1.0, %v554_v59 }
 0x161   :  { %497 = vmatmul.mubr.msk.f32.vlgmr.msra.gmra.mrb[0].mxu1 %vm119_vm0, %v360_v52 }
 0x234   :  { %v434_v60 = vpop.f32.mrb[0].mxu1 }
 0x235   :  { %v529_v62 = vadd.f32 %v434_v60, %v115_v58  ;;  %v498_v63 = vpop.f32.mrb[1].mxu1 }
 0x237   :  { %555 = vtanh.f32 %v529_v62 }
 0x238   :  { %557 = vrcp.f32 %v354_v61 }
 0x241   :  { %v556_v0 = vpop.eup %555 }
 0x242   :  { %v440_v1 = vsub.f32 %v556_v0, %v824_v26  ;;  %v558_v2 = vpop.eup %557 }
 0x244   :  { %v441_v3 = vmul.f32 %v558_v2, %v440_v1 }
 0x246   :  { %v442_v4 = vadd.f32 %v441_v3, %v824_v26 }
 0x248   :  { %443 = vst.msk [vmem:[#allocation11] sm:$0xff] %vm119_vm0, %v442_v4 }
 0x249   :  { %680 = shalt.err (!%p677_p2)
}
 0x24a   :  { %s681_s14 = scalar_lea.hbm %s855_s6, 128 }
 0x24b   :  { %p682_p3 = scmp.ne.s32.totalorder %s855_s6, %s681_s14  ;;  %p685_p4 = scmp.lt.u32.totalorder %s681_s14, %s855_s6 }
 0x24d   :  { %p687_p5 = pnand %p685_p4, %p682_p3 }
 0x24f   :  { %690 = shalt.err (!%p687_p5)
}
 0x250   :  { %453 = dma.vmem_to_hbm [thread:$0]  %s451_s10, 128, %s855_s6, [#allocation4]  }
 0x251   :  { %697 = dma.done.wait [#allocation4], 128  }
 0x252   :  { %698 = vsyncadd [#allocation4], 4294967168 }
 0x253   :  { %457 = vsyncpa [#allocation3], 1 }
 0x254   :  { %458 = vsyncpa [#allocation6], 1 }
 0x255   :  { %459 = vsyncpa [#allocation9], 1 }
 0x256   :  { %460 = vsyncpa [#allocation4], 1 }

// kernel: tpu_custom_call.1
= control target key start
LH: loop header
LB: loop body
LE: loop exit
PB: predicated region body
PF: predicated region fallthrough
CT: control target
= control target key end

     0   :  { %11 = vsyncpa [#allocation3], 0  ;;  %s849_s0 = inlined_call_operand.hbm [shape: f32[8,32], index: 0, kind: input, shape index: {}]   ;;  %s850_s1 = inlined_call_operand.hbm [shape: f32[8,32], index: 1, kind: input, shape index: {}]   ;;  %s851_s2 = inlined_call_operand.hbm [shape: f32[32,384], index: 2, kind: input, shape index: {}]   ;;  %s852_s3 = inlined_call_operand.hbm [shape: f32[32,256], index: 3, kind: input, shape index: {}]   ;;  %s853_s4 = inlined_call_operand.hbm [shape: f32[32,128], index: 4, kind: input, shape index: {}]   ;;  %s854_s5 = inlined_call_operand.vmem [shape: f32[1,384], index: 5, kind: input, shape index: {}]   ;;  %s855_s6 = inlined_call_operand.hbm [shape: f32[8,32], index: 6, kind: output, shape index: {}]  }
   0x1   :  { %12 = vsyncpa [#allocation6], 0 }
   0x2   :  { %13 = vsyncpa [#allocation9], 0 }
   0x3   :  { %14 = vsyncpa [#allocation4], 0  ;;  %s699_s21 = smov [#allocation5]   ;;  %s700_s23 = smov [#allocation8]  }
   0x4   :  { %s31_s22 = sshll.u32 %s699_s21, 4  ;;  %s52_s24 = sshll.u32 %s700_s23, 4  ;;  %s32_s22 = int_to_ptr.vmem [resolvable:$true] %s31_s22  ;;  %s749_s24 = int_to_ptr.vmem [resolvable:$true] %s52_s24 }
   0x5   :  { %s559_s27 = scalar_lea.hbm %s850_s1, 128 }
   0x6   :  { %p560_p0 = scmp.ne.s32.totalorder %s850_s1, %s559_s27  ;;  %p563_p1 = scmp.lt.u32.totalorder %s559_s27, %s850_s1 }
   0x8   :  { %p565_p2 = pnand %p563_p1, %p560_p0 }
   0xa   :  { %568 = shalt.err (!%p565_p2)
}
   0xb   :  { %s569_s8 = scalar_lea.vmem %s32_s22, 128  ;;  %p574_p4 = scmp.lt.s32.totalorder %s32_s22, %s32_s22 }
   0xc   :  { %p570_p3 = scmp.ne.s32.totalorder %s32_s22, %s569_s8  ;;  %p575_p5 = scmp.lt.s32.totalorder %s569_s8, %s569_s8 }
   0xe   :  { %p576_p6 = por %p575_p5, %p574_p4 }
  0x10   :  { %p577_p7 = pnand %p576_p6, %p570_p3 }
  0x12   :  { %580 = shalt.err (!%p577_p7)
}
  0x13   :  { %34 = dma.hbm_to_vmem [thread:$0]  %s850_s1, 128, %s32_s22, [#allocation6]  }
  0x14   :  { %s581_s13 = scalar_lea.hbm %s852_s3, 1024 }
  0x15   :  { %p582_p8 = scmp.ne.s32.totalorder %s852_s3, %s581_s13  ;;  %p585_p9 = scmp.lt.u32.totalorder %s581_s13, %s852_s3 }
  0x17   :  { %p587_p10 = pnand %p585_p9, %p582_p8 }
  0x19   :  { %590 = shalt.err (!%p587_p10)
}
  0x1a   :  { %s591_s18 = scalar_lea.vmem %s749_s24, 1024  ;;  %p596_p12 = scmp.lt.s32.totalorder %s749_s24, %s749_s24 }
  0x1b   :  { %p592_p11 = scmp.ne.s32.totalorder %s749_s24, %s591_s18  ;;  %p597_p13 = scmp.lt.s32.totalorder %s591_s18, %s591_s18 }
  0x1d   :  { %p598_p0 = por %p597_p13, %p596_p12 }
  0x1f   :  { %p599_p1 = pnand %p598_p0, %p592_p11 }
  0x21   :  { %602 = shalt.err (!%p599_p1)
}
  0x22   :  { %s701_s1 = smov 256   ;;  %s702_s19 = smov 16  }
  0x23   :  { %58 = dma.hbm_to_vmem [thread:$0]  %s852_s3, 1024, %s749_s24, [#allocation9], %s701_s1, %s701_s1, %s702_s19  }
  0x24   :  { %s703_s22 = smov [#allocation2]   ;;  %s704_s25 = smov [#allocation7]  }
  0x25   :  { %s21_s23 = sshll.u32 %s703_s22, 4  ;;  %s40_s26 = sshll.u32 %s704_s25, 4  ;;  %s22_s23 = int_to_ptr.vmem [resolvable:$true] %s21_s23  ;;  %s780_s26 = int_to_ptr.vmem [resolvable:$true] %s40_s26 }
  0x26   :  { %s603_s29 = scalar_lea.hbm %s849_s0, 128 }
  0x27   :  { %p604_p2 = scmp.ne.s32.totalorder %s849_s0, %s603_s29  ;;  %p607_p3 = scmp.lt.u32.totalorder %s603_s29, %s849_s0 }
  0x29   :  { %p609_p4 = pnand %p607_p3, %p604_p2 }
  0x2b   :  { %612 = shalt.err (!%p609_p4)
}
  0x2c   :  { %s613_s3 = scalar_lea.vmem %s22_s23, 128  ;;  %p618_p6 = scmp.lt.s32.totalorder %s22_s23, %s22_s23 }
  0x2d   :  { %p614_p5 = scmp.ne.s32.totalorder %s22_s23, %s613_s3  ;;  %p619_p7 = scmp.lt.s32.totalorder %s613_s3, %s613_s3 }
  0x2f   :  { %p620_p8 = por %p619_p7, %p618_p6 }
  0x31   :  { %p621_p9 = pnand %p620_p8, %p614_p5 }
  0x33   :  { %624 = shalt.err (!%p621_p9)
}
  0x34   :  { %24 = dma.hbm_to_vmem [thread:$0]  %s849_s0, 128, %s22_s23, [#allocation3]  }
  0x35   :  { %s625_s13 = scalar_lea.hbm %s851_s2, 1536 }
  0x36   :  { %p626_p10 = scmp.ne.s32.totalorder %s851_s2, %s625_s13  ;;  %p629_p11 = scmp.lt.u32.totalorder %s625_s13, %s851_s2 }
  0x38   :  { %p631_p12 = pnand %p629_p11, %p626_p10 }
  0x3a   :  { %634 = shalt.err (!%p631_p12)
}
  0x3b   :  { %s635_s18 = scalar_lea.vmem %s780_s26, 1536  ;;  %p640_p0 = scmp.lt.s32.totalorder %s780_s26, %s780_s26 }
  0x3c   :  { %p636_p13 = scmp.ne.s32.totalorder %s780_s26, %s635_s18  ;;  %p641_p1 = scmp.lt.s32.totalorder %s635_s18, %s635_s18 }
  0x3e   :  { %p642_p2 = por %p641_p1, %p640_p0 }
  0x40   :  { %p643_p3 = pnand %p642_p2, %p636_p13 }
  0x42   :  { %646 = shalt.err (!%p643_p3)
}
  0x43   :  { %s705_s0 = smov 384   ;;  %s706_s1 = smov 24  }
  0x44   :  { %46 = dma.hbm_to_vmem [thread:$0]  %s851_s2, 1536, %s780_s26, [#allocation6], %s705_s0, %s705_s0, %s706_s1  }
  0x45   :  { %s707_s21 = smov [#allocation10]   ;;  %s647_s27 = scalar_lea.hbm %s853_s4, 512 }
  0x46   :  { %s64_s22 = sshll.u32 %s707_s21, 4  ;;  %p648_p4 = scmp.ne.s32.totalorder %s853_s4, %s647_s27  ;;  %s65_s22 = int_to_ptr.vmem [resolvable:$true] %s64_s22 }
  0x47   :  { %p651_p5 = scmp.lt.u32.totalorder %s647_s27, %s853_s4 }
  0x49   :  { %p653_p6 = pnand %p651_p5, %p648_p4 }
  0x4b   :  { %656 = shalt.err (!%p653_p6)
}
  0x4c   :  { %s657_s8 = scalar_lea.vmem %s65_s22, 512  ;;  %p662_p8 = scmp.lt.s32.totalorder %s65_s22, %s65_s22 }
  0x4d   :  { %p658_p7 = scmp.ne.s32.totalorder %s65_s22, %s657_s8  ;;  %p663_p9 = scmp.lt.s32.totalorder %s657_s8, %s657_s8 }
  0x4f   :  { %p664_p10 = por %p663_p9, %p662_p8 }
  0x51   :  { %p665_p11 = pnand %p664_p10, %p658_p7 }
  0x53   :  { %668 = shalt.err (!%p665_p11)
}
  0x54   :  { %s708_s2 = smov 128   ;;  %s709_s26 = smov 8  }
  0x55   :  { %70 = dma.hbm_to_vmem [thread:$0]  %s853_s4, 512, %s65_s22, [#allocation9], %s708_s2, %s708_s2, %s709_s26  }
  0x56   :  { %691 = dma.done.wait [#allocation3], 128  }
  0x57   :  { %692 = vsyncadd [#allocation3], 4294967168 }
  0x58   :  { %693 = dma.done.wait [#allocation6], 1664  }
  0x59   :  { %694 = vsyncadd [#allocation6], 4294965632 }
  0x5a   :  { %695 = dma.done.wait [#allocation9], 1536  }
  0x5b   :  { %696 = vsyncadd [#allocation9], 4294965760  ;;  %v710_v0 = vmov 0.0   ;;  %v91_v1 = vld [vmem:[#allocation7 + $0x8] sm:$0xff]  ;;  %v94_v2 = vld [vmem:[#allocation7 + $0x20] sm:$0xff]  ;;  %vm119_vm0 = vcmask 261120   ;;  %v104_v40 = vlaneseq }
  0x5c   :  { %187 = vmatprep.mubr.f32.mxu0 %v710_v0  ;;  %v90_v3 = vld [vmem:[#allocation7] sm:$0xff]  ;;  %v499_v4 = vpack.c.bf16 %v94_v2, %v91_v1  ;;  %v93_v5 = vld [vmem:[#allocation7 + $0x18] sm:$0xff]  ;;  %v100_v7 = vld [vmem:[#allocation7 + $0x50] sm:$0xff]  ;;  %v711_v30 = vmov 0.0|0.0   ;;  %vm712_vm1 = vmmov 0  }
  0x5d   :  { %v97_v6 = vld [vmem:[#allocation7 + $0x38] sm:$0xff]  ;;  %v501_v8 = vpack.c.bf16 %v93_v5, %v90_v3  ;;  %v96_v10 = vld [vmem:[#allocation7 + $0x30] sm:$0xff]  ;;  %v99_v11 = vld [vmem:[#allocation7 + $0x48] sm:$0xff]  ;;  %507 = vmatprep.subr.bf16.mxu1 %v711_v30  ;;  %485 = vmatprep.mubr.msk.f32.mxu1 %vm712_vm1, %v710_v0  ;;  %v105_v41 = vshrl.u32 %v104_v40, 7 }
  0x5e   :  { %v503_v9 = vpack.c.bf16 %v100_v7, %v97_v6  ;;  %500 = vmatprep.subr.bf16.mxu0 %v499_v4  ;;  %v265_v12 = vld [vmem:[#allocation8 + $0x8] sm:$0xff]  ;;  %v267_v13 = vld [vmem:[#allocation8 + $0x18] sm:$0xff]  ;;  %v505_v14 = vpack.c.bf16 %v99_v11, %v96_v10  ;;  %v264_v16 = vld [vmem:[#allocation8] sm:$0xff] }
  0x5f   :  { %502 = vmatpush1.bf16.msra.mxu0 %v501_v8  ;;  %v513_v15 = vpack.c.bf16 %v267_v13, %v265_v12  ;;  %v266_v17 = vld [vmem:[#allocation8 + $0x10] sm:$0xff]  ;;  %v269_v18 = vld [vmem:[#allocation8 + $0x28] sm:$0xff]  ;;  %v271_v19 = vld [vmem:[#allocation8 + $0x38] sm:$0xff]  ;;  %v110_v42 = vsub.s32 1, %v105_v41  ;;  %v106_v53 = vsub.s32 0, %v105_v41  ;;  %v114_v57 = vsub.s32 2, %v105_v41 }
  0x60   :  { %504 = vmatprep.subr.bf16.mxu0 %v503_v9  ;;  %v88_v20 = vld [vmem:[#allocation2] sm:$0xff]  ;;  %v515_v21 = vpack.c.bf16 %v266_v17, %v264_v16  ;;  %v517_v22 = vpack.c.bf16 %v271_v19, %v269_v18  ;;  %v268_v23 = vld [vmem:[#allocation8 + $0x20] sm:$0xff]  ;;  %v824_v26 = vld [vmem:[#allocation5] sm:$0xff] }
  0x61   :  { %v270_v24 = vld [vmem:[#allocation8 + $0x30] sm:$0xff]  ;;  %v95_v28 = vld [vmem:[#allocation7 + $0x28] sm:$0xff]  ;;  %v98_v31 = vld [vmem:[#allocation7 + $0x40] sm:$0xff] }
  0x62   :  { %v519_v25 = vpack.c.bf16 %v270_v24, %v268_v23  ;;  %v92_v27 = vld [vmem:[#allocation7 + $0x10] sm:$0xff]  ;;  %v101_v32 = vld [vmem:[#allocation7 + $0x58] sm:$0xff]  ;;  %v361_v34 = vld [vmem:[#allocation10] sm:$0xff] }
  0x63   :  { %506 = vmatpush1.bf16.msra.mxu0 %v505_v14  ;;  %v508_v29 = vpack.c.bf16 %v95_v28, %v92_v27  ;;  %v511_v33 = vpack.c.bf16 %v101_v32, %v98_v31  ;;  %v362_v35 = vld [vmem:[#allocation10 + $0x8] sm:$0xff]  ;;  %v363_v37 = vld [vmem:[#allocation10 + $0x10] sm:$0xff]  ;;  %v364_v38 = vld [vmem:[#allocation10 + $0x18] sm:$0xff] }
  0x64   :  { %514 = vmatprep.subr.bf16.mxu0 %v513_v15  ;;  %v522_v36 = vpack.c.bf16 %v362_v35, %v361_v34  ;;  %v525_v39 = vpack.c.bf16 %v364_v38, %v363_v37  ;;  %v102_v43 = vld [vmem:[%s854_s5] sm:$0x7]  ;;  %s713_s5 = smov [#allocation11]  }
  0x65   :  { %509 = vmatpush3.bf16.msra.mxu1 %v508_v29  ;;  %v111_v44 = vrot.slane %v102_v43, %v110_v42  ;;  %v107_v54 = vrot.slane %v102_v43, %v106_v53  ;;  %v115_v58 = vrot.slane %v102_v43, %v114_v57  ;;  %s450_s10 = sshll.u32 %s713_s5, 4  ;;  %s451_s10 = int_to_ptr.vmem [resolvable:$true] %s450_s10 }
  0x66   :  { %461 = vmatmul.mubr.msk.f32.vlgmr.msra.gmra.mrb[0].mxu0 %vm119_vm0, %v88_v20  ;;  %510 = vmatprep.subr.bf16.mxu1 %v711_v30  ;;  %s669_s11 = scalar_lea.vmem %s451_s10, 128  ;;  %p674_p13 = scmp.lt.s32.totalorder %s451_s10, %s451_s10 }
  0x67   :  { %516 = vmatpush1.bf16.msra.mxu0 %v515_v21  ;;  %339 = vmatprep.mubr.f32.mxu0 %v710_v0  ;;  %p670_p12 = scmp.ne.s32.totalorder %s451_s10, %s669_s11  ;;  %p675_p0 = scmp.lt.s32.totalorder %s669_s11, %s669_s11 }
  0x68   :  { %518 = vmatprep.subr.bf16.mxu0 %v517_v22 }
  0x69   :  { %512 = vmatpush3.bf16.msra.mxu1 %v511_v33  ;;  %p676_p1 = por %p675_p0, %p674_p13 }
  0x6a   :  { %521 = vmatprep.subr.bf16.mxu1 %v711_v30 }
  0x6b   :  { %520 = vmatpush1.bf16.msra.mxu0 %v519_v25  ;;  %p677_p2 = pnand %p676_p1, %p670_p12 }
  0x6c   :  { %486 = vmatmul.mubr.msk.f32.vlgmr.msra.gmra.mrb[0].mxu1 %vm119_vm0, %v88_v20 }
  0x6d   :  { %523 = vmatpush3.bf16.msra.mxu1 %v522_v36  ;;  %496 = vmatprep.mubr.msk.f32.mxu1 %vm712_vm1, %v710_v0 }
  0x6e   :  { %463 = vmatmul.mubr.msk.f32.vlgmr.msra.gmra.mrb[0].mxu0 %vm119_vm0, %v824_v26  ;;  %524 = vmatprep.subr.bf16.mxu1 %v711_v30 }
  0x71   :  { %526 = vmatpush3.bf16.msra.mxu1 %v525_v39 }
 0x141   :  { %v341_v45 = vpop.f32.mrb[0].mxu0 }
 0x142   :  { %v343_v46 = vpop.f32.mrb[1].mxu0  ;;  %v527_v55 = vadd.f32 %v341_v45, %v107_v54 }
 0x143   :  { %v528_v47 = vadd.f32 %v343_v46, %v111_v44 }
 0x144   :  { %v464_v56 = vmul.f32 -1.442695, %v527_v55 }
 0x145   :  { %v465_v48 = vmul.f32 -1.442695, %v528_v47 }
 0x147   :  { %549 = vpow2.f32 %v465_v48 }
 0x151   :  { %v550_v49 = vpop.eup %549 }
 0x152   :  { %v355_v50 = vadd.f32 1.0, %v550_v49 }
 0x154   :  { %551 = vrcp.f32 %v355_v50 }
 0x155   :  { %553 = vpow2.f32 %v464_v56 }
 0x15e   :  { %v552_v51 = vpop.eup %551 }
 0x15f   :  { %v360_v52 = vmul.f32 %v552_v51, %v824_v26  ;;  %v554_v59 = vpop.eup %553 }
 0x160   :  { %v354_v61 = vadd.f32 1.0, %v554_v59 }
 0x161   :  { %497 = vmatmul.mubr.msk.f32.vlgmr.msra.gmra.mrb[0].mxu1 %vm119_vm0, %v360_v52 }
 0x234   :  { %v434_v60 = vpop.f32.mrb[0].mxu1 }
 0x235   :  { %v529_v62 = vadd.f32 %v434_v60, %v115_v58  ;;  %v498_v63 = vpop.f32.mrb[1].mxu1 }
 0x237   :  { %555 = vtanh.f32 %v529_v62 }
 0x238   :  { %557 = vrcp.f32 %v354_v61 }
 0x241   :  { %v556_v0 = vpop.eup %555 }
 0x242   :  { %v440_v1 = vsub.f32 %v556_v0, %v824_v26  ;;  %v558_v2 = vpop.eup %557 }
 0x244   :  { %v441_v3 = vmul.f32 %v558_v2, %v440_v1 }
 0x246   :  { %v442_v4 = vadd.f32 %v441_v3, %v824_v26 }
 0x248   :  { %443 = vst.msk [vmem:[#allocation11] sm:$0xff] %vm119_vm0, %v442_v4 }
 0x249   :  { %680 = shalt.err (!%p677_p2)
}
 0x24a   :  { %s681_s14 = scalar_lea.hbm %s855_s6, 128 }
 0x24b   :  { %p682_p3 = scmp.ne.s32.totalorder %s855_s6, %s681_s14  ;;  %p685_p4 = scmp.lt.u32.totalorder %s681_s14, %s855_s6 }
 0x24d   :  { %p687_p5 = pnand %p685_p4, %p682_p3 }
 0x24f   :  { %690 = shalt.err (!%p687_p5)
}
 0x250   :  { %453 = dma.vmem_to_hbm [thread:$0]  %s451_s10, 128, %s855_s6, [#allocation4]  }
 0x251   :  { %697 = dma.done.wait [#allocation4], 128  }
 0x252   :  { %698 = vsyncadd [#allocation4], 4294967168 }
 0x253   :  { %457 = vsyncpa [#allocation3], 1 }
 0x254   :  { %458 = vsyncpa [#allocation6], 1 }
 0x255   :  { %459 = vsyncpa [#allocation9], 1 }
 0x256   :  { %460 = vsyncpa [#allocation4], 1 }

</bundles_post_ra>
